<compile_context>
chip_gen: v5e
topology: v5e:2x2
jax: 0.10.0
libtpu: 0.0.40
codegen_flags: <defaults>
</compile_context>

<pallas_src>
import jax
import jax.numpy as jnp
from jax.experimental import pallas as pl
from jax.experimental.pallas import tpu as pltpu

C_IN = 4
C_OUT = 512
K = 15
PAD = K // 2          # 'same' padding for odd kernel, stride 1
KP = 64               # K * C_IN = 60, zero-padded to 64 for MXU/sublane alignment


def conv_dna_kernel(xe_ref, xo_ref, w_ref, b_ref, o_ref):
    """One (batch, L-tile) grid point.

    xe_ref: (1, KP, TLo)    im2col columns of EVEN conv positions, bf16
    xo_ref: (1, KP, TLo)    im2col columns of ODD  conv positions, bf16
    w_ref:  (C_OUT, KP)     flattened conv weights, bf16
    b_ref:  (C_OUT, 1)      bias, f32
    o_ref:  (1, C_OUT, TLo) pooled output tile (PyTorch NCL layout)
    """
    w = w_ref[...]                                                     # (C_OUT, KP)
    # Two MXU matmuls with a 64-deep contraction, f32 accumulation.
    y_even = jnp.dot(w, xe_ref[0], preferred_element_type=jnp.float32)  # (C_OUT, TLo)
    y_odd = jnp.dot(w, xo_ref[0], preferred_element_type=jnp.float32)   # (C_OUT, TLo)
    # MaxPool1d(2) == elementwise max of even/odd conv outputs; fold the bias in
    # AFTER the max (max(a+b, c+b) == max(a,c)+b) -> half the VPU adds.
    o_ref[0] = (jnp.maximum(y_even, y_odd) + b_ref[...]).astype(o_ref.dtype)


def conv_dna(x, weight, bias, *, tile_lo=2048):
    """x: (N, 4, L) float32 (PyTorch NCL).  Returns (N, 512, L // 2) float32.

    tile_lo: pooled-sequence tile size; must be a multiple of 128 (only relevant
             when L//2 > tile_lo).  2048 keeps per-step VMEM ~20 MiB (safe on v7x).
    """
    N, C, L = x.shape
    assert C == C_IN and L % 2 == 0
    Lo = L // 2

    # ---- wrapper-side glue: zero-pad + im2col in (N, KP, L) layout ----
    x_pad = jnp.pad(x, ((0, 0), (0, 0), (PAD, PAD)))                   # (N, 4, L+14)
    # cols[n, k*4 + c, l] = x_pad[n, c, l + k]
    cols = jnp.stack([x_pad[:, :, k:k + L] for k in range(K)], axis=1)  # (N, K, 4, L)
    cols = cols.reshape(N, K * C_IN, L)                                 # (N, 60, L)
    cols = jnp.pad(cols, ((0, 0), (0, KP - K * C_IN), (0, 0)))          # (N, 64, L)
    cols = cols.astype(jnp.bfloat16)
    xe = cols[:, :, 0::2]                                               # (N, 64, Lo)
    xo = cols[:, :, 1::2]                                               # (N, 64, Lo)

    # weight (C_OUT, C_IN, K) -> (C_OUT, KP) with [o, k*4 + c] = weight[o, c, k]
    w2 = jnp.transpose(weight, (0, 2, 1)).reshape(C_OUT, K * C_IN)
    w2 = jnp.pad(w2, ((0, 0), (0, KP - K * C_IN))).astype(jnp.bfloat16)
    b2 = bias.reshape(C_OUT, 1).astype(jnp.float32)

    # ---- tiling of the pooled-sequence axis ----
    tlo = Lo if Lo <= tile_lo else tile_lo          # tile_lo is a multiple of 128
    lo_pad = ((Lo + tlo - 1) // tlo) * tlo
    if lo_pad != Lo:
        xe = jnp.pad(xe, ((0, 0), (0, 0), (0, lo_pad - Lo)))
        xo = jnp.pad(xo, ((0, 0), (0, 0), (0, lo_pad - Lo)))

    grid = (N, lo_pad // tlo)
    flops = 2 * 2 * N * lo_pad * C_OUT * KP
    bytes_accessed = (xe.size + xo.size + w2.size) * 2 \
        + N * C_OUT * lo_pad * 4 + b2.size * 4

    out = pl.pallas_call(
        conv_dna_kernel,
        out_shape=jax.ShapeDtypeStruct((N, C_OUT, lo_pad), x.dtype),
        grid=grid,
        in_specs=[
            pl.BlockSpec((1, KP, tlo), lambda n, t: (n, 0, t)),
            pl.BlockSpec((1, KP, tlo), lambda n, t: (n, 0, t)),
            pl.BlockSpec((C_OUT, KP), lambda n, t: (0, 0)),   # resident weights
            pl.BlockSpec((C_OUT, 1), lambda n, t: (0, 0)),    # resident bias
        ],
        out_specs=pl.BlockSpec((1, C_OUT, tlo), lambda n, t: (n, 0, t)),
        compiler_params=pltpu.CompilerParams(
            dimension_semantics=("parallel", "parallel"),
            vmem_limit_bytes=48 * 1024 * 1024),
        cost_estimate=pl.CostEstimate(
            flops=flops, transcendentals=0, bytes_accessed=bytes_accessed),
    )(xe, xo, w2, b2)

    if lo_pad != Lo:
        out = out[:, :, :Lo]
    return out                                                          # (N, 512, Lo)


def conv_dna_reference(x, weight, bias):
    """Pure-JAX reference matching the PyTorch module (f32)."""
    y = jax.lax.conv_general_dilated(
        x, weight,
        window_strides=(1,),
        padding=[(PAD, PAD)],
        dimension_numbers=("NCH", "OIH", "NCH"),
        precision=jax.lax.Precision.HIGHEST,
    ) + bias[None, :, None]
    N, Co, Ly = y.shape
    return jnp.max(y.reshape(N, Co, Ly // 2, 2), axis=-1)


if __name__ == "__main__":
    key = jax.random.PRNGKey(0)
    k_x, k_w, k_b = jax.random.split(key, 3)

    N, L = 2, 16  # small, even sequence length
    x = jax.random.normal(k_x, (N, C_IN, L), dtype=jnp.float32)

    # Deterministic synthetic parameters (Conv1d(4, 512, 15) shapes).
    fan_in = C_IN * K
    weight = jax.random.normal(k_w, (C_OUT, C_IN, K), dtype=jnp.float32) / jnp.sqrt(fan_in)
    bias = jax.random.normal(k_b, (C_OUT,), dtype=jnp.float32) * 0.01

    out = jax.block_until_ready(conv_dna(x, weight, bias))
    assert out.shape == (N, C_OUT, L // 2), out.shape

    # Tight check vs a reference using bf16-rounded operands (f32 accumulation),
    # loose check vs the exact f32 module semantics.
    ref_bf16 = conv_dna_reference(
        x.astype(jnp.bfloat16).astype(jnp.float32),
        weight.astype(jnp.bfloat16).astype(jnp.float32), bias)
    ref_f32 = conv_dna_reference(x, weight, bias)
    err_bf16 = float(jnp.max(jnp.abs(out - ref_bf16)))
    err_f32 = float(jnp.max(jnp.abs(out - ref_f32)))
    assert err_bf16 < 1e-3, err_bf16
    assert err_f32 < 5e-2, err_f32

    print("KERNEL_OK")
</pallas_src>

<mosaic_0001>
module attributes {stable_mosaic.version = 11 : i64} {
  func.func @conv_dna_kernel(%arg0: i32, %arg1: i32, %arg2: memref<1x64x8xbf16, #tpu.memory_space<vmem>>, %arg3: memref<1x64x8xbf16, #tpu.memory_space<vmem>>, %arg4: memref<512x64xbf16, #tpu.memory_space<vmem>>, %arg5: memref<512x1xf32, #tpu.memory_space<vmem>>, %arg6: memref<1x512x8xf32, #tpu.memory_space<vmem>>) attributes {dimension_semantics = [#tpu.dimension_semantics<parallel>, #tpu.dimension_semantics<parallel>], iteration_bounds = array<i64: 2, 1>, scalar_prefetch = 0 : i64, scratch_operands = 0 : i64, tpu.core_type = #tpu.core_type<tc>, window_params = [{transform_indices = @transform_0, window_bounds = array<i64: 1, 64, 8>}, {transform_indices = @transform_1, window_bounds = array<i64: 1, 64, 8>}, {pipeline_mode = #tpu.pipeline_mode<synchronous>, transform_indices = @transform_2, window_bounds = array<i64: 512, 64>}, {pipeline_mode = #tpu.pipeline_mode<synchronous>, transform_indices = @transform_3, window_bounds = array<i64: 512, 1>}, {transform_indices = @transform_4, window_bounds = array<i64: 1, 512, 8>}]} {
    %c0 = arith.constant 0 : index
    %c0_0 = arith.constant 0 : index
    %0 = vector.load %arg4[%c0, %c0_0] : memref<512x64xbf16, #tpu.memory_space<vmem>>, vector<512x64xbf16>
    %c0_1 = arith.constant 0 : index
    %c0_2 = arith.constant 0 : index
    %c0_3 = arith.constant 0 : index
    %1 = vector.load %arg2[%c0_1, %c0_2, %c0_3] : memref<1x64x8xbf16, #tpu.memory_space<vmem>>, vector<1x64x8xbf16>
    %2 = vector.shape_cast %1 : vector<1x64x8xbf16> to vector<64x8xbf16>
    %cst = arith.constant dense<0.000000e+00> : vector<512x8xf32>
    %3 = tpu.matmul %0, %2, %cst {dimension_numbers = #tpu.dot_dimension_numbers<[1], [0], [0], [1], [0, 0, 1, 1], [], []>} : vector<512x64xbf16>, vector<64x8xbf16>, vector<512x8xf32> -> vector<512x8xf32>
    %c0_4 = arith.constant 0 : index
    %c0_5 = arith.constant 0 : index
    %c0_6 = arith.constant 0 : index
    %4 = vector.load %arg3[%c0_4, %c0_5, %c0_6] : memref<1x64x8xbf16, #tpu.memory_space<vmem>>, vector<1x64x8xbf16>
    %5 = vector.shape_cast %4 : vector<1x64x8xbf16> to vector<64x8xbf16>
    %cst_7 = arith.constant dense<0.000000e+00> : vector<512x8xf32>
    %6 = tpu.matmul %0, %5, %cst_7 {dimension_numbers = #tpu.dot_dimension_numbers<[1], [0], [0], [1], [0, 0, 1, 1], [], []>} : vector<512x64xbf16>, vector<64x8xbf16>, vector<512x8xf32> -> vector<512x8xf32>
    %7 = arith.maximumf %3, %6 : vector<512x8xf32>
    %c0_8 = arith.constant 0 : index
    %c0_9 = arith.constant 0 : index
    %8 = vector.load %arg5[%c0_8, %c0_9] : memref<512x1xf32, #tpu.memory_space<vmem>>, vector<512x1xf32>
    %9 = vector.broadcast %8 : vector<512x1xf32> to vector<512x8xf32>
    %10 = arith.addf %7, %9 : vector<512x8xf32>
    %c0_10 = arith.constant 0 : index
    %c0_11 = arith.constant 0 : index
    %c0_12 = arith.constant 0 : index
    %11 = vector.load %arg6[%c0_10, %c0_11, %c0_12] : memref<1x512x8xf32, #tpu.memory_space<vmem>>, vector<1x512x8xf32>
    %12 = vector.shape_cast %11 : vector<1x512x8xf32> to vector<512x8xf32>
    %13 = vector.shape_cast %10 : vector<512x8xf32> to vector<1x512x8xf32>
    tpu.vector_store %arg6[%c0_10, %c0_11, %c0_12], %13 {strides = array<i32>} : memref<1x512x8xf32, #tpu.memory_space<vmem>>, vector<1x512x8xf32>,
    return
  }
  func.func @transform_0(%arg0: i32, %arg1: i32) -> (i32, i32, i32) {
    %c0_i32 = arith.constant 0 : i32
    %c0_i32_0 = arith.constant 0 : i32
    return %arg0, %c0_i32, %arg1 : i32, i32, i32
  }
  func.func @transform_1(%arg0: i32, %arg1: i32) -> (i32, i32, i32) {
    %c0_i32 = arith.constant 0 : i32
    %c0_i32_0 = arith.constant 0 : i32
    return %arg0, %c0_i32, %arg1 : i32, i32, i32
  }
  func.func @transform_2(%arg0: i32, %arg1: i32) -> (i32, i32) {
    %c0_i32 = arith.constant 0 : i32
    %c0_i32_0 = arith.constant 0 : i32
    %c0_i32_1 = arith.constant 0 : i32
    return %c0_i32, %c0_i32_0 : i32, i32
  }
  func.func @transform_3(%arg0: i32, %arg1: i32) -> (i32, i32) {
    %c0_i32 = arith.constant 0 : i32
    %c0_i32_0 = arith.constant 0 : i32
    %c0_i32_1 = arith.constant 0 : i32
    return %c0_i32, %c0_i32_0 : i32, i32
  }
  func.func @transform_4(%arg0: i32, %arg1: i32) -> (i32, i32, i32) {
    %c0_i32 = arith.constant 0 : i32
    %c0_i32_0 = arith.constant 0 : i32
    return %arg0, %c0_i32, %arg1 : i32, i32, i32
  }
}

</mosaic_0001>

<bundles_post_ra>
// kernel: tpu_custom_call.1
= control target key start
LH: loop header
LB: loop body
LE: loop exit
PB: predicated region body
PF: predicated region fallthrough
CT: control target
= control target key end

     0   :  { %s2028_s15 = smov 0   ;;  %s2030_s16 = smov 0   ;;  %s2655_s0 = inlined_call_operand.vmem [shape: bf16[2,64,8], index: 0, kind: input, shape index: {}]   ;;  %s2656_s1 = inlined_call_operand.vmem [shape: bf16[2,64,8], index: 1, kind: input, shape index: {}]   ;;  %s2657_s2 = inlined_call_operand.vmem [shape: bf16[512,64], index: 2, kind: input, shape index: {}]   ;;  %s2658_s3 = inlined_call_operand.vmem [shape: f32[512,1], index: 3, kind: input, shape index: {}]   ;;  %s2659_s4 = inlined_call_operand.vmem [shape: f32[2,512,8], index: 4, kind: output, shape index: {}]  }
   0x1   :  { %s2032_s17 = smov 0  }
   0x2 LB: > { %s26_s18 = sadd.s32 1, %s1996_s16  ;;  %p1666_p0 = scmp.ge.s32.totalorder %s2000_s17, 1  ;;  %s2000_s17 = sphi %s2032_s17, %s14_s17   ;;  %s1996_s16 = sphi %s2030_s16, %s2661_s16   ;;  %s1992_s15 = sphi %s2028_s15, %s2660_s15  }
   0x3   : > { %p28_p1 = scmp.ge.s32.totalorder %s26_s18, 2  ;;  %p196_p2 = scmp.lt.s32.totalorder %s2000_s17, 3 }
   0x5   : > { %s2663_s18 = smov (%p28_p1, %s26_s18), 0  ;;  %p197_p3 = pnand %p1666_p0, %p196_p2 }
   0x6   : > { %p236_p4 = scmp.lt.s32.totalorder (!%p197_p3), %s1992_s15, 1 }
   0x7   : > { %200 = sbr.rel (%p197_p3) target bundleno = 418 (0x1a2), region = 36 }
   0xc   : > { %v1052_v0 = vld [vmem:[%s2658_s3 + $0x20] sm:$0xff]  ;;  %v1050_v1 = vld [vmem:[%s2658_s3 + $0x10] sm:$0xff]  ;;  %v2002_v3 = vmov 0   ;;  %s2665_s15 = smov (!%p236_p4, %s1992_s15), 1  ;;  %v1053_v6 = vld [vmem:[%s2658_s3 + $0x28] sm:$0xff]  ;;  %vm517_vm0 = vcmask 523264  }
   0xd   : > { %v1048_v2 = vld [vmem:[%s2658_s3] sm:$0xff]  ;;  %1977 = vset.pattern.permute.xlu2 %v2002_v3  ;;  %1976 = vset.pattern.permute.xlu1 %v2002_v3  ;;  %s1899_s25 = sshll.u32 %s2665_s15, 5  ;;  %v1051_v7 = vld [vmem:[%s2658_s3 + $0x18] sm:$0xff]  ;;  %v1049_v8 = vld [vmem:[%s2658_s3 + $0x8] sm:$0xff]  ;;  %s1901_s22 = sshll.u32 %s2665_s15, 9  ;;  %vm1496_vm1 = vcmask 64512  }
   0xe   : > { %1975 = vset.pattern.permute.xlu0 %v2002_v3  ;;  %1134 = vperm.xlu2 %1977, %v1052_v0   ;;  %s243_s28 = scalar_lea.vmem %s2655_s0, %s1899_s25  ;;  %s251_s5 = scalar_lea.vmem %s2656_s1, %s1899_s25  ;;  %v1056_v13 = vld [vmem:[%s2658_s3 + $0x40] sm:$0xff]  ;;  %v1055_v14 = vld [vmem:[%s2658_s3 + $0x38] sm:$0xff]  ;;  %v1054_v15 = vld [vmem:[%s2658_s3 + $0x30] sm:$0xff] }
   0xf   : > { %1124 = vperm.xlu1 %1976, %v1050_v1   ;;  %1114 = vperm.xlu0 %1975, %v1048_v2   ;;  %v1937_v4 = vld [vmem:[%s243_s28 + $0x18] sm:$0xff]  ;;  %v1936_v9 = vld [vmem:[%s243_s28 + $0x10] sm:$0xff]  ;;  %v1935_v11 = vld [vmem:[%s243_s28 + $0x8] sm:$0xff]  ;;  %s2355_s27 = scalar_lea.vmem %s2659_s4, %s1901_s22 }
  0x10   : > { %v1941_v5 = vld [vmem:[%s251_s5 + $0x18] sm:$0xff]  ;;  %618 = vmatpush.bf16.msra.mxu0 %v1937_v4  ;;  %1942 = vmatpush.bf16.msra.mxu2 %v1937_v4  ;;  %v1940_v10 = vld [vmem:[%s251_s5 + $0x10] sm:$0xff]  ;;  %v1939_v12 = vld [vmem:[%s251_s5 + $0x8] sm:$0xff] }
  0x11   : > { %819 = vmatpush.bf16.msra.mxu1 %v1941_v5  ;;  %1946 = vmatpush.bf16.msra.mxu3 %v1941_v5  ;;  %v1934_v16 = vld [vmem:[%s243_s28] sm:$0xff]  ;;  %v1059_v20 = vld [vmem:[%s2658_s3 + $0x58] sm:$0xff]  ;;  %v1058_v21 = vld [vmem:[%s2658_s3 + $0x50] sm:$0xff] }
  0x12   : > { %v1938_v17 = vld [vmem:[%s251_s5] sm:$0xff]  ;;  %v1057_v22 = vld [vmem:[%s2658_s3 + $0x48] sm:$0xff]  ;;  %v1062_v23 = vld [vmem:[%s2658_s3 + $0x70] sm:$0xff] }
  0x13   : > { %v1902_v18 = vld [vmem:[%s2657_s2] sm:$0xff]  ;;  %v1061_v24 = vld [vmem:[%s2658_s3 + $0x68] sm:$0xff]  ;;  %v1063_v30 = vld [vmem:[%s2658_s3 + $0x78] sm:$0xff] }
  0x14   : > { %619 = vmatpush.bf16.msra.mxu0 %v1936_v9  ;;  %1943 = vmatpush.bf16.msra.mxu2 %v1936_v9  ;;  %v1918_v19 = vld [vmem:[%s2657_s2 + $0x80] sm:$0xff]  ;;  %v1903_v26 = vld [vmem:[%s2657_s2 + $0x8] sm:$0xff]  ;;  %v1067_v32 = vld [vmem:[%s2658_s3 + $0x98] sm:$0xff] }
  0x15   : > { %820 = vmatpush.bf16.msra.mxu1 %v1940_v10  ;;  %1947 = vmatpush.bf16.msra.mxu3 %v1940_v10  ;;  %v1060_v25 = vld [vmem:[%s2658_s3 + $0x60] sm:$0xff]  ;;  %v1919_v27 = vld [vmem:[%s2657_s2 + $0x88] sm:$0xff]  ;;  %v1066_v33 = vld [vmem:[%s2658_s3 + $0x90] sm:$0xff] }
  0x16   : > { %1139 = vperm.xlu2 %1977, %v1053_v6   ;;  %v1065_v28 = vld [vmem:[%s2658_s3 + $0x88] sm:$0xff]  ;;  %v1064_v29 = vld [vmem:[%s2658_s3 + $0x80] sm:$0xff]  ;;  %v1904_v34 = vld [vmem:[%s2657_s2 + $0x10] sm:$0xff] }
  0x17   : > { %1129 = vperm.xlu1 %1976, %v1051_v7   ;;  %1119 = vperm.xlu0 %1975, %v1049_v8   ;;  %v1068_v31 = vld [vmem:[%s2658_s3 + $0xa0] sm:$0xff]  ;;  %v1920_v35 = vld [vmem:[%s2657_s2 + $0x90] sm:$0xff]  ;;  %v1071_v36 = vld [vmem:[%s2658_s3 + $0xb8] sm:$0xff] }
  0x18   : > { %620 = vmatpush.bf16.msra.mxu0 %v1935_v11  ;;  %1944 = vmatpush.bf16.msra.mxu2 %v1935_v11  ;;  %v1070_v37 = vld [vmem:[%s2658_s3 + $0xb0] sm:$0xff]  ;;  %v1069_v38 = vld [vmem:[%s2658_s3 + $0xa8] sm:$0xff]  ;;  %v1072_v41 = vld [vmem:[%s2658_s3 + $0xc0] sm:$0xff] }
  0x19   : > { %821 = vmatpush.bf16.msra.mxu1 %v1939_v12  ;;  %1948 = vmatpush.bf16.msra.mxu3 %v1939_v12  ;;  %v1074_v39 = vld [vmem:[%s2658_s3 + $0xd0] sm:$0xff]  ;;  %v1073_v40 = vld [vmem:[%s2658_s3 + $0xc8] sm:$0xff]  ;;  %v1905_v42 = vld [vmem:[%s2657_s2 + $0x18] sm:$0xff] }
  0x1a   : > { %v1921_v43 = vld [vmem:[%s2657_s2 + $0x98] sm:$0xff]  ;;  %v1077_v44 = vld [vmem:[%s2658_s3 + $0xe8] sm:$0xff]  ;;  %v1076_v45 = vld [vmem:[%s2658_s3 + $0xe0] sm:$0xff] }
  0x1b   : > { %v1075_v46 = vld [vmem:[%s2658_s3 + $0xd8] sm:$0xff]  ;;  %v1080_v47 = vld [vmem:[%s2658_s3 + $0x100] sm:$0xff]  ;;  %v1078_v49 = vld [vmem:[%s2658_s3 + $0xf0] sm:$0xff] }
  0x1c   : > { %621 = vmatpush.bf16.msra.mxu0 %v1934_v16  ;;  %1945 = vmatpush.bf16.msra.mxu2 %v1934_v16  ;;  %v1079_v48 = vld [vmem:[%s2658_s3 + $0xf8] sm:$0xff]  ;;  %v1906_v50 = vld [vmem:[%s2657_s2 + $0x20] sm:$0xff]  ;;  %v1082_v53 = vld [vmem:[%s2658_s3 + $0x110] sm:$0xff] }
  0x1d   : > { %822 = vmatpush.bf16.msra.mxu1 %v1938_v17  ;;  %1949 = vmatpush.bf16.msra.mxu3 %v1938_v17  ;;  %v1922_v51 = vld [vmem:[%s2657_s2 + $0xa0] sm:$0xff]  ;;  %v1083_v52 = vld [vmem:[%s2658_s3 + $0x118] sm:$0xff]  ;;  %v1081_v54 = vld [vmem:[%s2658_s3 + $0x108] sm:$0xff] }
  0x1e   : > { %1154 = vperm.xlu2 %1977, %v1056_v13   ;;  %v1086_v56 = vld [vmem:[%s2658_s3 + $0x130] sm:$0xff]  ;;  %v1085_v57 = vld [vmem:[%s2658_s3 + $0x128] sm:$0xff]  ;;  %v1084_v58 = vld [vmem:[%s2658_s3 + $0x120] sm:$0xff] }
  0x1f   : > { %1149 = vperm.xlu1 %1976, %v1055_v14   ;;  %1144 = vperm.xlu0 %1975, %v1054_v15   ;;  %v1907_v59 = vld [vmem:[%s2657_s2 + $0x28] sm:$0xff]  ;;  %v1088_v63 = vld [vmem:[%s2658_s3 + $0x140] sm:$0xff]  ;;  %v1087_v0 = vld [vmem:[%s2658_s3 + $0x138] sm:$0xff] }
  0x20   : > { %1817 = vmatmul.msk.bf16.vlgmr.msra.gmra.mxu0 %vm517_vm0, %v1902_v18  ;;  %1833 = vmatmul.msk.bf16.vlgmr.msra.gmra.mxu2 %vm517_vm0, %v1918_v19  ;;  %v1923_v60 = vld [vmem:[%s2657_s2 + $0xa8] sm:$0xff]  ;;  %v1092_v2 = vld [vmem:[%s2658_s3 + $0x160] sm:$0xff]  ;;  %v1091_v3 = vld [vmem:[%s2658_s3 + $0x158] sm:$0xff] }
  0x21   : > { %1865 = vmatmul.msk.bf16.vlgmr.msra.gmra.mxu1 %vm517_vm0, %v1902_v18  ;;  %1881 = vmatmul.msk.bf16.vlgmr.msra.gmra.mxu3 %vm517_vm0, %v1918_v19  ;;  %v1089_v62 = vld [vmem:[%s2658_s3 + $0x148] sm:$0xff]  ;;  %v1090_v4 = vld [vmem:[%s2658_s3 + $0x150] sm:$0xff]  ;;  %v1095_v10 = vld [vmem:[%s2658_s3 + $0x178] sm:$0xff] }
  0x22   : > { %v1908_v5 = vld [vmem:[%s2657_s2 + $0x30] sm:$0xff]  ;;  %v1093_v12 = vld [vmem:[%s2658_s3 + $0x168] sm:$0xff]  ;;  %v1096_v18 = vld [vmem:[%s2658_s3 + $0x180] sm:$0xff] }
  0x23   : > { %v1924_v6 = vld [vmem:[%s2657_s2 + $0xb0] sm:$0xff]  ;;  %v1097_v17 = vld [vmem:[%s2658_s3 + $0x188] sm:$0xff]  ;;  %v1909_v19 = vld [vmem:[%s2657_s2 + $0x38] sm:$0xff] }
  0x24   : > { %v1094_v11 = vld [vmem:[%s2658_s3 + $0x170] sm:$0xff] }
  0x25   : > { %v1098_v16 = vld [vmem:[%s2658_s3 + $0x190] sm:$0xff] }
  0x26   : > { %1169 = vperm.xlu2 %1977, %v1059_v20   ;;  %v1925_v20 = vld [vmem:[%s2657_s2 + $0xb8] sm:$0xff] }
  0x27   : > { %1164 = vperm.xlu1 %1976, %v1058_v21   ;;  %1159 = vperm.xlu0 %1975, %v1057_v22  }
  0x2e   : > { %1184 = vperm.xlu2 %1977, %v1062_v23  }
  0x2f   : > { %1179 = vperm.xlu1 %1976, %v1061_v24   ;;  %1174 = vperm.xlu0 %1975, %v1060_v25   ;;  %v1101_v24 = vld [vmem:[%s2658_s3 + $0x1a8] sm:$0xff]  ;;  %v1100_v25 = vld [vmem:[%s2658_s3 + $0x1a0] sm:$0xff] }
  0x30   : > { %1818 = vmatmul.msk.bf16.gmra.mxu0 %vm517_vm0, %v1903_v26  ;;  %1834 = vmatmul.msk.bf16.gmra.mxu2 %vm517_vm0, %v1919_v27 }
  0x31   : > { %1866 = vmatmul.msk.bf16.gmra.mxu1 %vm517_vm0, %v1903_v26  ;;  %1882 = vmatmul.msk.bf16.gmra.mxu3 %vm517_vm0, %v1919_v27  ;;  %v1099_v26 = vld [vmem:[%s2658_s3 + $0x198] sm:$0xff] }
  0x36   : > { %1199 = vperm.xlu2 %1977, %v1065_v28  }
  0x37   : > { %1194 = vperm.xlu1 %1976, %v1064_v29   ;;  %1189 = vperm.xlu0 %1975, %v1063_v30   ;;  %v1104_v30 = vld [vmem:[%s2658_s3 + $0x1c0] sm:$0xff] }
  0x3e   : > { %1214 = vperm.xlu2 %1977, %v1068_v31   ;;  %v1103_v31 = vld [vmem:[%s2658_s3 + $0x1b8] sm:$0xff] }
  0x3f   : > { %1209 = vperm.xlu1 %1976, %v1067_v32   ;;  %1204 = vperm.xlu0 %1975, %v1066_v33   ;;  %v1102_v32 = vld [vmem:[%s2658_s3 + $0x1b0] sm:$0xff]  ;;  %v1910_v33 = vld [vmem:[%s2657_s2 + $0x40] sm:$0xff] }
  0x40   : > { %1819 = vmatmul.msk.bf16.gmra.mxu0 %vm517_vm0, %v1904_v34  ;;  %1835 = vmatmul.msk.bf16.gmra.mxu2 %vm517_vm0, %v1920_v35 }
  0x41   : > { %1867 = vmatmul.msk.bf16.gmra.mxu1 %vm517_vm0, %v1904_v34  ;;  %1883 = vmatmul.msk.bf16.gmra.mxu3 %vm517_vm0, %v1920_v35  ;;  %v1926_v34 = vld [vmem:[%s2657_s2 + $0xc0] sm:$0xff] }
  0x46   : > { %1229 = vperm.xlu2 %1977, %v1071_v36  }
  0x47   : > { %1224 = vperm.xlu1 %1976, %v1070_v37   ;;  %1219 = vperm.xlu0 %1975, %v1069_v38  }
  0x4e   : > { %1244 = vperm.xlu2 %1977, %v1074_v39  }
  0x4f   : > { %1239 = vperm.xlu1 %1976, %v1073_v40   ;;  %1234 = vperm.xlu0 %1975, %v1072_v41   ;;  %v1107_v41 = vld [vmem:[%s2658_s3 + $0x1d8] sm:$0xff] }
  0x50   : > { %1820 = vmatmul.msk.bf16.gmra.mxu0 %vm517_vm0, %v1905_v42  ;;  %1836 = vmatmul.msk.bf16.gmra.mxu2 %vm517_vm0, %v1921_v43 }
  0x51   : > { %1868 = vmatmul.msk.bf16.gmra.mxu1 %vm517_vm0, %v1905_v42  ;;  %1884 = vmatmul.msk.bf16.gmra.mxu3 %vm517_vm0, %v1921_v43  ;;  %v1106_v42 = vld [vmem:[%s2658_s3 + $0x1d0] sm:$0xff]  ;;  %v1105_v43 = vld [vmem:[%s2658_s3 + $0x1c8] sm:$0xff] }
  0x56   : > { %1259 = vperm.xlu2 %1977, %v1077_v44  }
  0x57   : > { %1254 = vperm.xlu1 %1976, %v1076_v45   ;;  %1249 = vperm.xlu0 %1975, %v1075_v46  }
  0x5e   : > { %1274 = vperm.xlu2 %1977, %v1080_v47  }
  0x5f   : > { %1269 = vperm.xlu1 %1976, %v1079_v48   ;;  %1264 = vperm.xlu0 %1975, %v1078_v49  }
  0x60   : > { %1821 = vmatmul.msk.bf16.gmra.mxu0 %vm517_vm0, %v1906_v50  ;;  %1837 = vmatmul.msk.bf16.gmra.mxu2 %vm517_vm0, %v1922_v51 }
  0x61   : > { %1869 = vmatmul.msk.bf16.gmra.mxu1 %vm517_vm0, %v1906_v50  ;;  %1885 = vmatmul.msk.bf16.gmra.mxu3 %vm517_vm0, %v1922_v51 }
  0x66   : > { %1289 = vperm.xlu2 %1977, %v1083_v52  }
  0x67   : > { %1284 = vperm.xlu1 %1976, %v1082_v53   ;;  %1279 = vperm.xlu0 %1975, %v1081_v54   ;;  %v1110_v53 = vld [vmem:[%s2658_s3 + $0x1f0] sm:$0xff]  ;;  %v1109_v54 = vld [vmem:[%s2658_s3 + $0x1e8] sm:$0xff] }
  0x68   : > { %v2213_v55 = vpop.permute.xlu2 %1134 }
  0x6e   : > { %1304 = vperm.xlu2 %1977, %v1086_v56   ;;  %v1108_v56 = vld [vmem:[%s2658_s3 + $0x1e0] sm:$0xff] }
  0x6f   : > { %1299 = vperm.xlu1 %1976, %v1085_v57   ;;  %1294 = vperm.xlu0 %1975, %v1084_v58  }
  0x70   : > { %v2230_v61 = vpop.permute.xlu2 %1139  ;;  %1822 = vmatmul.msk.bf16.gmra.mxu0 %vm517_vm0, %v1907_v59  ;;  %1838 = vmatmul.msk.bf16.gmra.mxu2 %vm517_vm0, %v1923_v60 }
  0x71   : > { %1870 = vmatmul.msk.bf16.gmra.mxu1 %vm517_vm0, %v1907_v59  ;;  %1886 = vmatmul.msk.bf16.gmra.mxu3 %vm517_vm0, %v1923_v60  ;;  %v1911_v60 = vld [vmem:[%s2657_s2 + $0x48] sm:$0xff] }
  0x76   : > { %1319 = vperm.xlu2 %1977, %v1089_v62   ;;  %v1927_v62 = vld [vmem:[%s2657_s2 + $0xc8] sm:$0xff] }
  0x77   : > { %1314 = vperm.xlu1 %1976, %v1088_v63   ;;  %1309 = vperm.xlu0 %1975, %v1087_v0  }
  0x78   : > { %v2245_v1 = vpop.permute.xlu2 %1154 }
  0x7e   : > { %1334 = vperm.xlu2 %1977, %v1092_v2  }
  0x7f   : > { %1329 = vperm.xlu1 %1976, %v1091_v3   ;;  %1324 = vperm.xlu0 %1975, %v1090_v4  }
  0x80   : > { %v2262_v7 = vpop.permute.xlu2 %1169  ;;  %1823 = vmatmul.msk.bf16.gmra.mxu0 %vm517_vm0, %v1908_v5  ;;  %1839 = vmatmul.msk.bf16.gmra.mxu2 %vm517_vm0, %v1924_v6 }
  0x81   : > { %v2264_v8 = vpop.permute.xlu1 %1124  ;;  %v1115_v9 = vpop.permute.xlu0 %1114  ;;  %1871 = vmatmul.msk.bf16.gmra.mxu1 %vm517_vm0, %v1908_v5  ;;  %1887 = vmatmul.msk.bf16.gmra.mxu3 %vm517_vm0, %v1924_v6  ;;  %v1111_v6 = vld [vmem:[%s2658_s3 + $0x1f8] sm:$0xff] }
  0x86   : > { %1349 = vperm.xlu2 %1977, %v1095_v10  }
  0x87   : > { %1344 = vperm.xlu1 %1976, %v1094_v11   ;;  %1339 = vperm.xlu0 %1975, %v1093_v12  }
  0x88   : > { %v2279_v13 = vpop.permute.xlu2 %1184 }
  0x89   : > { %v2281_v14 = vpop.permute.xlu1 %1129  ;;  %v2283_v15 = vpop.permute.xlu0 %1119 }
  0x8e   : > { %1364 = vperm.xlu2 %1977, %v1098_v16  }
  0x8f   : > { %1359 = vperm.xlu1 %1976, %v1097_v17   ;;  %1354 = vperm.xlu0 %1975, %v1096_v18  }
  0x90   : > { %v2300_v21 = vpop.permute.xlu2 %1199  ;;  %1824 = vmatmul.msk.bf16.gmra.mxu0 %vm517_vm0, %v1909_v19  ;;  %1840 = vmatmul.msk.bf16.gmra.mxu2 %vm517_vm0, %v1925_v20 }
  0x91   : > { %v2302_v22 = vpop.permute.xlu1 %1149  ;;  %v2304_v23 = vpop.permute.xlu0 %1144  ;;  %1872 = vmatmul.msk.bf16.gmra.mxu1 %vm517_vm0, %v1909_v19  ;;  %1888 = vmatmul.msk.bf16.gmra.mxu3 %vm517_vm0, %v1925_v20 }
  0x96   : > { %1379 = vperm.xlu2 %1977, %v1101_v24  }
  0x97   : > { %1374 = vperm.xlu1 %1976, %v1100_v25   ;;  %1369 = vperm.xlu0 %1975, %v1099_v26  }
  0x98   : > { %v2319_v27 = vpop.permute.xlu2 %1214 }
  0x99   : > { %v2321_v28 = vpop.permute.xlu1 %1164  ;;  %v2323_v29 = vpop.permute.xlu0 %1159 }
  0x9d   : > { %v623_v36 = vpop.f32.mrf.mxu0 }
  0x9e   : > { %1394 = vperm.xlu2 %1977, %v1104_v30   ;;  %v824_v39 = vpop.f32.mrf.mxu1  ;;  %v1912_v30 = vld [vmem:[%s2657_s2 + $0x50] sm:$0xff] }
  0x9f   : > { %1389 = vperm.xlu1 %1976, %v1103_v31   ;;  %1384 = vperm.xlu0 %1975, %v1102_v32   ;;  %v984_v40 = vmax.f32 %v623_v36, %v824_v39  ;;  %v1928_v31 = vld [vmem:[%s2657_s2 + $0xd0] sm:$0xff] }
  0xa0   : > { %v2340_v35 = vpop.permute.xlu2 %1229  ;;  %1825 = vmatmul.msk.bf16.gmra.mxu0 %vm517_vm0, %v1910_v33  ;;  %1841 = vmatmul.msk.bf16.gmra.mxu2 %vm517_vm0, %v1926_v34 }
  0xa1   : > { %v2343_v37 = vpop.permute.xlu1 %1179  ;;  %v2345_v38 = vpop.permute.xlu0 %1174  ;;  %1873 = vmatmul.msk.bf16.gmra.mxu1 %vm517_vm0, %v1910_v33  ;;  %1889 = vmatmul.msk.bf16.gmra.mxu3 %vm517_vm0, %v1926_v34  ;;  %v1432_v44 = vadd.f32 %v1115_v9, %v984_v40 }
  0xa3   : > { %v703_v45 = vpop.f32.mrf.mxu2  ;;  %1497 = vst.msk [vmem:[%s2355_s27] sm:$0xff] %vm1496_vm1, %v1432_v44 }
  0xa4   : > { %v904_v46 = vpop.f32.mrf.mxu3 }
  0xa5   : > { %v625_v48 = vpop.f32.mrf.mxu0  ;;  %v1016_v11 = vmax.f32 %v703_v45, %v904_v46 }
  0xa6   : > { %1409 = vperm.xlu2 %1977, %v1107_v41   ;;  %v826_v51 = vpop.f32.mrf.mxu1 }
  0xa7   : > { %1404 = vperm.xlu1 %1976, %v1106_v42   ;;  %1399 = vperm.xlu0 %1975, %v1105_v43   ;;  %v985_v52 = vmax.f32 %v625_v48, %v826_v51 }
  0xa8   : > { %v2367_v47 = vpop.permute.xlu2 %1244 }
  0xa9   : > { %v2369_v49 = vpop.permute.xlu1 %1194  ;;  %v2371_v50 = vpop.permute.xlu0 %1189  ;;  %v1433_v57 = vadd.f32 %v2283_v15, %v985_v52 }
  0xab   : > { %v2383_v58 = vpop.f32.mrf.mxu2  ;;  %1498 = vst.msk [vmem:[%s2355_s27 + $0x8] sm:$0xff] %vm1496_vm1, %v1433_v57  ;;  %v1929_v57 = vld [vmem:[%s2657_s2 + $0xd8] sm:$0xff] }
  0xac   : > { %v2387_v59 = vpop.f32.mrf.mxu3 }
  0xad   : > { %v628_v0 = vpop.f32.mrf.mxu0 }
  0xae   : > { %1424 = vperm.xlu2 %1977, %v1110_v53   ;;  %v829_v4 = vpop.f32.mrf.mxu1 }
  0xaf   : > { %1419 = vperm.xlu1 %1976, %v1109_v54   ;;  %1414 = vperm.xlu0 %1975, %v1108_v56   ;;  %v986_v5 = vmax.f32 %v628_v0, %v829_v4 }
  0xb0   : > { %v2395_v63 = vpop.permute.xlu2 %1259  ;;  %1826 = vmatmul.msk.bf16.gmra.mxu0 %vm517_vm0, %v1911_v60  ;;  %1842 = vmatmul.msk.bf16.gmra.mxu2 %vm517_vm0, %v1927_v62 }
  0xb1   : > { %v2397_v2 = vpop.permute.xlu1 %1209  ;;  %v2399_v3 = vpop.permute.xlu0 %1204  ;;  %1874 = vmatmul.msk.bf16.gmra.mxu1 %vm517_vm0, %v1911_v60  ;;  %1890 = vmatmul.msk.bf16.gmra.mxu3 %vm517_vm0, %v1927_v62  ;;  %v1434_v9 = vadd.f32 %v2264_v8, %v986_v5 }
  0xb3   : > { %v2409_v10 = vpop.f32.mrf.mxu2  ;;  %1499 = vst.msk [vmem:[%s2355_s27 + $0x10] sm:$0xff] %vm1496_vm1, %v1434_v9 }
  0xb4   : > { %v2413_v12 = vpop.f32.mrf.mxu3 }
  0xb5   : > { %v630_v16 = vpop.f32.mrf.mxu0 }
  0xb6   : > { %v831_v20 = vpop.f32.mrf.mxu1 }
  0xb7   : > { %1429 = vperm.xlu0 %1975, %v1111_v6   ;;  %v987_v8 = vmax.f32 %v630_v16, %v831_v20 }
  0xb8   : > { %v1275_v15 = vpop.permute.xlu2 %1274 }
  0xb9   : > { %v1464_v17 = vadd.f32 %v1275_v15, %v1016_v11  ;;  %v2415_v18 = vpop.permute.xlu1 %1224  ;;  %v2417_v19 = vpop.permute.xlu0 %1219  ;;  %v1435_v24 = vadd.f32 %v2281_v14, %v987_v8  ;;  %v1017_v11 = vmax.f32 %v2383_v58, %v2387_v59  ;;  %v1018_v15 = vmax.f32 %v2409_v10, %v2413_v12  ;;  %v1914_v12 = vld [vmem:[%s2657_s2 + $0x60] sm:$0xff] }
  0xbb   : > { %1529 = vst.msk [vmem:[%s2355_s27 + $0x100] sm:$0xff] %vm1496_vm1, %v1464_v17  ;;  %v710_v25 = vpop.f32.mrf.mxu2 }
  0xbc   : > { %1500 = vst.msk [vmem:[%s2355_s27 + $0x18] sm:$0xff] %vm1496_vm1, %v1435_v24  ;;  %v911_v26 = vpop.f32.mrf.mxu3 }
  0xbd   : > { %v1019_v32 = vmax.f32 %v710_v25, %v911_v26  ;;  %v633_v34 = vpop.f32.mrf.mxu0 }
  0xbe   : > { %v834_v40 = vpop.f32.mrf.mxu1 }
  0xbf   : > { %v988_v41 = vmax.f32 %v633_v34, %v834_v40 }
  0xc0   : > { %v1290_v33 = vpop.permute.xlu2 %1289  ;;  %1827 = vmatmul.msk.bf16.gmra.mxu0 %vm517_vm0, %v1912_v30  ;;  %1843 = vmatmul.msk.bf16.gmra.mxu2 %vm517_vm0, %v1928_v31 }
  0xc1   : > { %v2430_v36 = vpop.permute.xlu1 %1239  ;;  %v2432_v14 = vpop.permute.xlu0 %1234  ;;  %v1467_v39 = vadd.f32 %v1290_v33, %v1019_v32  ;;  %1875 = vmatmul.msk.bf16.gmra.mxu1 %vm517_vm0, %v1912_v30  ;;  %1891 = vmatmul.msk.bf16.gmra.mxu3 %vm517_vm0, %v1928_v31  ;;  %v1436_v42 = vadd.f32 %v2213_v55, %v988_v41  ;;  %v1913_v55 = vld [vmem:[%s2657_s2 + $0x58] sm:$0xff]  ;;  %v1930_v32 = vld [vmem:[%s2657_s2 + $0xe0] sm:$0xff] }
  0xc3   : > { %1532 = vst.msk [vmem:[%s2355_s27 + $0x118] sm:$0xff] %vm1496_vm1, %v1467_v39  ;;  %v713_v43 = vpop.f32.mrf.mxu2 }
  0xc4   : > { %1501 = vst.msk [vmem:[%s2355_s27 + $0x20] sm:$0xff] %vm1496_vm1, %v1436_v42  ;;  %v914_v44 = vpop.f32.mrf.mxu3 }
  0xc5   : > { %v635_v45 = vpop.f32.mrf.mxu0  ;;  %v1020_v33 = vmax.f32 %v713_v43, %v914_v44 }
  0xc6   : > { %v836_v51 = vpop.f32.mrf.mxu1 }
  0xc7   : > { %v989_v52 = vmax.f32 %v635_v45, %v836_v51 }
  0xc8   : > { %v1305_v16 = vpop.permute.xlu2 %1304 }
  0xc9   : > { %v2443_v46 = vpop.permute.xlu1 %1254  ;;  %v2445_v48 = vpop.permute.xlu0 %1249  ;;  %v1437_v53 = vadd.f32 %v2230_v61, %v989_v52 }
  0xcb   : > { %v715_v54 = vpop.f32.mrf.mxu2  ;;  %1502 = vst.msk [vmem:[%s2355_s27 + $0x28] sm:$0xff] %vm1496_vm1, %v1437_v53 }
  0xcc   : > { %v916_v56 = vpop.f32.mrf.mxu3 }
  0xcd   : > { %v638_v60 = vpop.f32.mrf.mxu0  ;;  %v1021_v34 = vmax.f32 %v715_v54, %v916_v56 }
  0xce   : > { %v839_v4 = vpop.f32.mrf.mxu1 }
  0xcf   : > { %v990_v61 = vmax.f32 %v638_v60, %v839_v4 }
  0xd0   : > { %1828 = vmatmul.msk.bf16.gmra.mxu0 %vm517_vm0, %v1913_v55  ;;  %1844 = vmatmul.msk.bf16.gmra.mxu2 %vm517_vm0, %v1929_v57 }
  0xd1   : > { %v2456_v62 = vpop.permute.xlu1 %1269  ;;  %v2458_v0 = vpop.permute.xlu0 %1264  ;;  %1876 = vmatmul.msk.bf16.gmra.mxu1 %vm517_vm0, %v1913_v55  ;;  %1892 = vmatmul.msk.bf16.gmra.mxu3 %vm517_vm0, %v1929_v57  ;;  %v1438_v5 = vadd.f32 %v2304_v23, %v990_v61 }
  0xd3   : > { %v718_v6 = vpop.f32.mrf.mxu2  ;;  %1503 = vst.msk [vmem:[%s2355_s27 + $0x30] sm:$0xff] %vm1496_vm1, %v1438_v5 }
  0xd4   : > { %v919_v9 = vpop.f32.mrf.mxu3 }
  0xd5   : > { %v1022_v17 = vmax.f32 %v718_v6, %v919_v9  ;;  %v640_v20 = vpop.f32.mrf.mxu0 }
  0xd6   : > { %v841_v30 = vpop.f32.mrf.mxu1 }
  0xd7   : > { %v1470_v23 = vadd.f32 %v1305_v16, %v1022_v17  ;;  %v991_v31 = vmax.f32 %v640_v20, %v841_v30  ;;  %v1320_v20 = vpop.permute.xlu2 %1319 }
  0xd9   : > { %v1285_v8 = vpop.permute.xlu1 %1284  ;;  %v1280_v24 = vpop.permute.xlu0 %1279  ;;  %1535 = vst.msk [vmem:[%s2355_s27 + $0x130] sm:$0xff] %vm1496_vm1, %v1470_v23  ;;  %v1439_v58 = vadd.f32 %v2302_v22, %v991_v31 }
  0xda   : > { %v1466_v25 = vadd.f32 %v1285_v8, %v1018_v15  ;;  %v1465_v26 = vadd.f32 %v1280_v24, %v1017_v11  ;;  %v1915_v11 = vld [vmem:[%s2657_s2 + $0x68] sm:$0xff] }
  0xdb   : > { %v720_v59 = vpop.f32.mrf.mxu2  ;;  %1504 = vst.msk [vmem:[%s2355_s27 + $0x38] sm:$0xff] %vm1496_vm1, %v1439_v58  ;;  %v1931_v15 = vld [vmem:[%s2657_s2 + $0xe8] sm:$0xff] }
  0xdc   : > { %1531 = vst.msk [vmem:[%s2355_s27 + $0x110] sm:$0xff] %vm1496_vm1, %v1466_v25  ;;  %v921_v10 = vpop.f32.mrf.mxu3 }
  0xdd   : > { %1530 = vst.msk [vmem:[%s2355_s27 + $0x108] sm:$0xff] %vm1496_vm1, %v1465_v26  ;;  %v643_v22 = vpop.f32.mrf.mxu0  ;;  %v1023_v53 = vmax.f32 %v720_v59, %v921_v10 }
  0xde   : > { %v844_v45 = vpop.f32.mrf.mxu1 }
  0xdf   : > { %v992_v51 = vmax.f32 %v643_v22, %v844_v45  ;;  %v1932_v22 = vld [vmem:[%s2657_s2 + $0xf0] sm:$0xff] }
  0xe0   : > { %1829 = vmatmul.msk.bf16.gmra.mxu0 %vm517_vm0, %v1914_v12  ;;  %1845 = vmatmul.msk.bf16.gmra.mxu2 %vm517_vm0, %v1930_v32 }
  0xe1   : > { %v1300_v39 = vpop.permute.xlu1 %1299  ;;  %v1295_v40 = vpop.permute.xlu0 %1294  ;;  %1877 = vmatmul.msk.bf16.gmra.mxu1 %vm517_vm0, %v1914_v12  ;;  %1893 = vmatmul.msk.bf16.gmra.mxu3 %vm517_vm0, %v1930_v32  ;;  %v1440_v43 = vadd.f32 %v2245_v1, %v992_v51 }
  0xe2   : > { %v1469_v41 = vadd.f32 %v1300_v39, %v1021_v34  ;;  %v1468_v42 = vadd.f32 %v1295_v40, %v1020_v33 }
  0xe3   : > { %v723_v44 = vpop.f32.mrf.mxu2  ;;  %1505 = vst.msk [vmem:[%s2355_s27 + $0x40] sm:$0xff] %vm1496_vm1, %v1440_v43 }
  0xe4   : > { %1534 = vst.msk [vmem:[%s2355_s27 + $0x128] sm:$0xff] %vm1496_vm1, %v1469_v41  ;;  %v924_v52 = vpop.f32.mrf.mxu3 }
  0xe5   : > { %1533 = vst.msk [vmem:[%s2355_s27 + $0x120] sm:$0xff] %vm1496_vm1, %v1468_v42  ;;  %v1024_v54 = vmax.f32 %v723_v44, %v924_v52  ;;  %v645_v56 = vpop.f32.mrf.mxu0 }
  0xe6   : > { %v846_v61 = vpop.f32.mrf.mxu1 }
  0xe7   : > { %v993_v5 = vmax.f32 %v645_v56, %v846_v61 }
  0xe9   : > { %v1315_v55 = vpop.permute.xlu1 %1314  ;;  %v1310_v57 = vpop.permute.xlu0 %1309  ;;  %v1441_v1 = vadd.f32 %v2323_v29, %v993_v5  ;;  %v1933_v5 = vld [vmem:[%s2657_s2 + $0xf8] sm:$0xff] }
  0xea   : > { %v1472_v60 = vadd.f32 %v1315_v55, %v1024_v54  ;;  %v1471_v4 = vadd.f32 %v1310_v57, %v1023_v53  ;;  %v1335_v54 = vpop.permute.xlu2 %1334 }
  0xeb   : > { %v725_v6 = vpop.f32.mrf.mxu2  ;;  %1506 = vst.msk [vmem:[%s2355_s27 + $0x48] sm:$0xff] %vm1496_vm1, %v1441_v1 }
  0xec   : > { %1537 = vst.msk [vmem:[%s2355_s27 + $0x140] sm:$0xff] %vm1496_vm1, %v1472_v60  ;;  %v926_v9 = vpop.f32.mrf.mxu3 }
  0xed   : > { %1536 = vst.msk [vmem:[%s2355_s27 + $0x138] sm:$0xff] %vm1496_vm1, %v1471_v4  ;;  %v1025_v16 = vmax.f32 %v725_v6, %v926_v9  ;;  %v648_v17 = vpop.f32.mrf.mxu0 }
  0xee   : > { %v849_v24 = vpop.f32.mrf.mxu1 }
  0xef   : > { %v1473_v8 = vadd.f32 %v1320_v20, %v1025_v16  ;;  %v994_v23 = vmax.f32 %v648_v17, %v849_v24 }
  0xf0   : > { %1830 = vmatmul.msk.bf16.gmra.mxu0 %vm517_vm0, %v1915_v11  ;;  %1846 = vmatmul.msk.bf16.gmra.mxu2 %vm517_vm0, %v1931_v15 }
  0xf1   : > { %1538 = vst.msk [vmem:[%s2355_s27 + $0x148] sm:$0xff] %vm1496_vm1, %v1473_v8  ;;  %1878 = vmatmul.msk.bf16.gmra.mxu1 %vm517_vm0, %v1915_v11  ;;  %1894 = vmatmul.msk.bf16.gmra.mxu3 %vm517_vm0, %v1931_v15  ;;  %v1442_v29 = vadd.f32 %v2321_v28, %v994_v23  ;;  %v1325_v58 = vpop.permute.xlu0 %1324  ;;  %v1916_v28 = vld [vmem:[%s2657_s2 + $0x70] sm:$0xff]  ;;  %v1330_v41 = vpop.permute.xlu1 %1329 }
  0xf3   : > { %v728_v25 = vpop.f32.mrf.mxu2  ;;  %1507 = vst.msk [vmem:[%s2355_s27 + $0x50] sm:$0xff] %vm1496_vm1, %v1442_v29 }
  0xf4   : > { %v929_v26 = vpop.f32.mrf.mxu3 }
  0xf5   : > { %v1026_v30 = vmax.f32 %v728_v25, %v929_v26  ;;  %v650_v31 = vpop.f32.mrf.mxu0 }
  0xf6   : > { %v851_v10 = vpop.f32.mrf.mxu1 }
  0xf7   : > { %v1474_v59 = vadd.f32 %v1325_v58, %v1026_v30  ;;  %v995_v12 = vmax.f32 %v650_v31, %v851_v10  ;;  %v1350_v10 = vpop.permute.xlu2 %1349 }
  0xf9   : > { %1539 = vst.msk [vmem:[%s2355_s27 + $0x150] sm:$0xff] %vm1496_vm1, %v1474_v59  ;;  %v1443_v32 = vadd.f32 %v2262_v7, %v995_v12  ;;  %v1340_v9 = vpop.permute.xlu0 %1339  ;;  %v1345_v23 = vpop.permute.xlu1 %1344 }
  0xfb   : > { %v730_v33 = vpop.f32.mrf.mxu2  ;;  %1508 = vst.msk [vmem:[%s2355_s27 + $0x58] sm:$0xff] %vm1496_vm1, %v1443_v32 }
  0xfc   : > { %v931_v34 = vpop.f32.mrf.mxu3 }
  0xfd   : > { %v1027_v39 = vmax.f32 %v730_v33, %v931_v34  ;;  %v653_v40 = vpop.f32.mrf.mxu0 }
  0xfe   : > { %v854_v45 = vpop.f32.mrf.mxu1 }
  0xff   : > { %v1475_v42 = vadd.f32 %v1330_v41, %v1027_v39  ;;  %v996_v51 = vmax.f32 %v653_v40, %v854_v45 }
 0x100   : > { %1831 = vmatmul.msk.bf16.gmra.mxu0 %vm517_vm0, %v1916_v28  ;;  %1847 = vmatmul.msk.bf16.gmra.mxu2 %vm517_vm0, %v1932_v22 }
 0x101   : > { %1540 = vst.msk [vmem:[%s2355_s27 + $0x158] sm:$0xff] %vm1496_vm1, %v1475_v42  ;;  %1879 = vmatmul.msk.bf16.gmra.mxu1 %vm517_vm0, %v1916_v28  ;;  %1895 = vmatmul.msk.bf16.gmra.mxu3 %vm517_vm0, %v1932_v22  ;;  %v1444_v7 = vadd.f32 %v2345_v38, %v996_v51  ;;  %v1917_v38 = vld [vmem:[%s2657_s2 + $0x78] sm:$0xff]  ;;  %v1355_v40 = vpop.permute.xlu0 %1354 }
 0x103   : > { %v733_v43 = vpop.f32.mrf.mxu2  ;;  %1509 = vst.msk [vmem:[%s2355_s27 + $0x60] sm:$0xff] %vm1496_vm1, %v1444_v7 }
 0x104   : > { %v934_v44 = vpop.f32.mrf.mxu3 }
 0x105   : > { %v1028_v52 = vmax.f32 %v733_v43, %v934_v44  ;;  %v655_v53 = vpop.f32.mrf.mxu0 }
 0x106   : > { %v856_v55 = vpop.f32.mrf.mxu1 }
 0x107   : > { %v1476_v56 = vadd.f32 %v1335_v54, %v1028_v52  ;;  %v997_v57 = vmax.f32 %v655_v53, %v856_v55  ;;  %v1360_v52 = vpop.permute.xlu1 %1359 }
 0x109   : > { %1541 = vst.msk [vmem:[%s2355_s27 + $0x160] sm:$0xff] %vm1496_vm1, %v1476_v56  ;;  %v1445_v60 = vadd.f32 %v2343_v37, %v997_v57 }
 0x10b   : > { %v735_v4 = vpop.f32.mrf.mxu2  ;;  %1510 = vst.msk [vmem:[%s2355_s27 + $0x68] sm:$0xff] %vm1496_vm1, %v1445_v60 }
 0x10c   : > { %v936_v61 = vpop.f32.mrf.mxu3 }
 0x10d   : > { %v1029_v1 = vmax.f32 %v735_v4, %v936_v61  ;;  %v658_v6 = vpop.f32.mrf.mxu0  ;;  %v1365_v61 = vpop.permute.xlu2 %1364 }
 0x10e   : > { %v859_v15 = vpop.f32.mrf.mxu1 }
 0x10f   : > { %v1477_v11 = vadd.f32 %v1340_v9, %v1029_v1  ;;  %v998_v16 = vmax.f32 %v658_v6, %v859_v15 }
 0x110   : > { %1832 = vmatmul.msk.bf16.gmra.mxu0 %vm517_vm0, %v1917_v38  ;;  %1848 = vmatmul.msk.bf16.gmra.mxu2 %vm517_vm0, %v1933_v5 }
 0x111   : > { %1542 = vst.msk [vmem:[%s2355_s27 + $0x168] sm:$0xff] %vm1496_vm1, %v1477_v11  ;;  %1880 = vmatmul.msk.bf16.gmra.mxu1 %vm517_vm0, %v1917_v38  ;;  %1896 = vmatmul.msk.bf16.gmra.mxu3 %vm517_vm0, %v1933_v5  ;;  %v1446_v37 = vadd.f32 %v2279_v13, %v998_v16  ;;  %v1370_v16 = vpop.permute.xlu0 %1369 }
 0x113   : > { %v738_v17 = vpop.f32.mrf.mxu2  ;;  %1511 = vst.msk [vmem:[%s2355_s27 + $0x70] sm:$0xff] %vm1496_vm1, %v1446_v37 }
 0x114   : > { %v939_v20 = vpop.f32.mrf.mxu3 }
 0x115   : > { %v1030_v8 = vmax.f32 %v738_v17, %v939_v20  ;;  %v660_v24 = vpop.f32.mrf.mxu0 }
 0x116   : > { %v861_v25 = vpop.f32.mrf.mxu1 }
 0x117   : > { %v1478_v29 = vadd.f32 %v1345_v23, %v1030_v8  ;;  %v999_v26 = vmax.f32 %v660_v24, %v861_v25  ;;  %v1375_v25 = vpop.permute.xlu1 %1374 }
 0x119   : > { %1543 = vst.msk [vmem:[%s2355_s27 + $0x170] sm:$0xff] %vm1496_vm1, %v1478_v29  ;;  %v1447_v30 = vadd.f32 %v2371_v50, %v999_v26 }
 0x11b   : > { %v740_v31 = vpop.f32.mrf.mxu2  ;;  %1512 = vst.msk [vmem:[%s2355_s27 + $0x78] sm:$0xff] %vm1496_vm1, %v1447_v30 }
 0x11c   : > { %v941_v13 = vpop.f32.mrf.mxu3 }
 0x11d   : > { %v1031_v58 = vmax.f32 %v740_v31, %v941_v13  ;;  %v663_v59 = vpop.f32.mrf.mxu0 }
 0x11e   : > { %v864_v32 = vpop.f32.mrf.mxu1 }
 0x11f   : > { %v1479_v12 = vadd.f32 %v1350_v10, %v1031_v58  ;;  %v1000_v33 = vmax.f32 %v663_v59, %v864_v32 }
 0x121   : > { %1544 = vst.msk [vmem:[%s2355_s27 + $0x178] sm:$0xff] %vm1496_vm1, %v1479_v12  ;;  %v1448_v34 = vadd.f32 %v2369_v49, %v1000_v33  ;;  %v1380_v12 = vpop.permute.xlu2 %1379 }
 0x123   : > { %v743_v28 = vpop.f32.mrf.mxu2  ;;  %1513 = vst.msk [vmem:[%s2355_s27 + $0x80] sm:$0xff] %vm1496_vm1, %v1448_v34 }
 0x124   : > { %v944_v50 = vpop.f32.mrf.mxu3 }
 0x125   : > { %v1032_v22 = vmax.f32 %v743_v28, %v944_v50  ;;  %v665_v39 = vpop.f32.mrf.mxu0 }
 0x126   : > { %v866_v42 = vpop.f32.mrf.mxu1 }
 0x127   : > { %v1480_v41 = vadd.f32 %v1355_v40, %v1032_v22  ;;  %v1001_v45 = vmax.f32 %v665_v39, %v866_v42  ;;  %v1385_v40 = vpop.permute.xlu0 %1384 }
 0x129   : > { %1545 = vst.msk [vmem:[%s2355_s27 + $0x180] sm:$0xff] %vm1496_vm1, %v1480_v41  ;;  %v1449_v51 = vadd.f32 %v2300_v21, %v1001_v45 }
 0x12b   : > { %v745_v7 = vpop.f32.mrf.mxu2  ;;  %1514 = vst.msk [vmem:[%s2355_s27 + $0x88] sm:$0xff] %vm1496_vm1, %v1449_v51 }
 0x12c   : > { %v946_v49 = vpop.f32.mrf.mxu3 }
 0x12d   : > { %v1033_v43 = vmax.f32 %v745_v7, %v946_v49  ;;  %v668_v44 = vpop.f32.mrf.mxu0 }
 0x12e   : > { %v869_v54 = vpop.f32.mrf.mxu1 }
 0x12f   : > { %v1481_v53 = vadd.f32 %v1360_v52, %v1033_v43  ;;  %v1002_v56 = vmax.f32 %v668_v44, %v869_v54  ;;  %v1390_v44 = vpop.permute.xlu1 %1389 }
 0x131   : > { %1546 = vst.msk [vmem:[%s2355_s27 + $0x188] sm:$0xff] %vm1496_vm1, %v1481_v53  ;;  %v1450_v55 = vadd.f32 %v2399_v3, %v1002_v56 }
 0x133   : > { %v748_v57 = vpop.f32.mrf.mxu2  ;;  %1515 = vst.msk [vmem:[%s2355_s27 + $0x90] sm:$0xff] %vm1496_vm1, %v1450_v55 }
 0x134   : > { %v949_v21 = vpop.f32.mrf.mxu3 }
 0x135   : > { %v1034_v60 = vmax.f32 %v748_v57, %v949_v21  ;;  %v670_v4 = vpop.f32.mrf.mxu0 }
 0x136   : > { %v871_v5 = vpop.f32.mrf.mxu1 }
 0x137   : > { %v1482_v38 = vadd.f32 %v1365_v61, %v1034_v60  ;;  %v1003_v1 = vmax.f32 %v670_v4, %v871_v5  ;;  %v1395_v60 = vpop.permute.xlu2 %1394 }
 0x139   : > { %1547 = vst.msk [vmem:[%s2355_s27 + $0x190] sm:$0xff] %vm1496_vm1, %v1482_v38  ;;  %v1451_v6 = vadd.f32 %v2397_v2, %v1003_v1 }
 0x13b   : > { %v750_v9 = vpop.f32.mrf.mxu2  ;;  %1516 = vst.msk [vmem:[%s2355_s27 + $0x98] sm:$0xff] %vm1496_vm1, %v1451_v6 }
 0x13c   : > { %v951_v3 = vpop.f32.mrf.mxu3 }
 0x13d   : > { %v1035_v11 = vmax.f32 %v750_v9, %v951_v3  ;;  %v673_v15 = vpop.f32.mrf.mxu0  ;;  %v1400_v3 = vpop.permute.xlu0 %1399 }
 0x13e   : > { %v874_v17 = vpop.f32.mrf.mxu1 }
 0x13f   : > { %v1483_v37 = vadd.f32 %v1370_v16, %v1035_v11  ;;  %v1004_v20 = vmax.f32 %v673_v15, %v874_v17 }
 0x141   : > { %1548 = vst.msk [vmem:[%s2355_s27 + $0x198] sm:$0xff] %vm1496_vm1, %v1483_v37  ;;  %v1452_v8 = vadd.f32 %v2319_v27, %v1004_v20 }
 0x143   : > { %v753_v24 = vpop.f32.mrf.mxu2  ;;  %1517 = vst.msk [vmem:[%s2355_s27 + $0xa0] sm:$0xff] %vm1496_vm1, %v1452_v8 }
 0x144   : > { %v954_v2 = vpop.f32.mrf.mxu3 }
 0x145   : > { %v1036_v23 = vmax.f32 %v753_v24, %v954_v2  ;;  %v675_v29 = vpop.f32.mrf.mxu0  ;;  %v1405_v24 = vpop.permute.xlu1 %1404 }
 0x146   : > { %v876_v30 = vpop.f32.mrf.mxu1 }
 0x147   : > { %v1484_v26 = vadd.f32 %v1375_v25, %v1036_v23  ;;  %v1005_v31 = vmax.f32 %v675_v29, %v876_v30 }
 0x149   : > { %1549 = vst.msk [vmem:[%s2355_s27 + $0x1a0] sm:$0xff] %vm1496_vm1, %v1484_v26  ;;  %v1453_v13 = vadd.f32 %v2417_v19, %v1005_v31 }
 0x14b   : > { %v755_v58 = vpop.f32.mrf.mxu2  ;;  %1518 = vst.msk [vmem:[%s2355_s27 + $0xa8] sm:$0xff] %vm1496_vm1, %v1453_v13  ;;  %v1410_v13 = vpop.permute.xlu2 %1409 }
 0x14c   : > { %v956_v27 = vpop.f32.mrf.mxu3 }
 0x14d   : > { %v1037_v59 = vmax.f32 %v755_v58, %v956_v27  ;;  %v678_v10 = vpop.f32.mrf.mxu0 }
 0x14e   : > { %v879_v33 = vpop.f32.mrf.mxu1 }
 0x14f   : > { %v1485_v32 = vadd.f32 %v1380_v12, %v1037_v59  ;;  %v1006_v34 = vmax.f32 %v678_v10, %v879_v33 }
 0x151   : > { %1550 = vst.msk [vmem:[%s2355_s27 + $0x1a8] sm:$0xff] %vm1496_vm1, %v1485_v32  ;;  %v1454_v28 = vadd.f32 %v2415_v18, %v1006_v34  ;;  %v1415_v34 = vpop.permute.xlu0 %1414 }
 0x153   : > { %v758_v50 = vpop.f32.mrf.mxu2  ;;  %1519 = vst.msk [vmem:[%s2355_s27 + $0xb0] sm:$0xff] %vm1496_vm1, %v1454_v28 }
 0x154   : > { %v959_v19 = vpop.f32.mrf.mxu3 }
 0x155   : > { %v1038_v22 = vmax.f32 %v758_v50, %v959_v19  ;;  %v680_v39 = vpop.f32.mrf.mxu0 }
 0x156   : > { %v881_v42 = vpop.f32.mrf.mxu1 }
 0x157   : > { %v1486_v41 = vadd.f32 %v1385_v40, %v1038_v22  ;;  %v1007_v45 = vmax.f32 %v680_v39, %v881_v42  ;;  %v1420_v42 = vpop.permute.xlu1 %1419 }
 0x159   : > { %1551 = vst.msk [vmem:[%s2355_s27 + $0x1b0] sm:$0xff] %vm1496_vm1, %v1486_v41  ;;  %v1455_v51 = vadd.f32 %v2340_v35, %v1007_v45 }
 0x15b   : > { %v760_v7 = vpop.f32.mrf.mxu2  ;;  %1520 = vst.msk [vmem:[%s2355_s27 + $0xb8] sm:$0xff] %vm1496_vm1, %v1455_v51 }
 0x15c   : > { %v961_v18 = vpop.f32.mrf.mxu3 }
 0x15d   : > { %v1039_v49 = vmax.f32 %v760_v7, %v961_v18  ;;  %v683_v43 = vpop.f32.mrf.mxu0 }
 0x15e   : > { %v884_v53 = vpop.f32.mrf.mxu1 }
 0x15f   : > { %v1487_v52 = vadd.f32 %v1390_v44, %v1039_v49  ;;  %v1008_v54 = vmax.f32 %v683_v43, %v884_v53 }
 0x161   : > { %1552 = vst.msk [vmem:[%s2355_s27 + $0x1b8] sm:$0xff] %vm1496_vm1, %v1487_v52  ;;  %v1456_v56 = vadd.f32 %v2432_v14, %v1008_v54  ;;  %v1425_v52 = vpop.permute.xlu2 %1424 }
 0x163   : > { %v763_v55 = vpop.f32.mrf.mxu2  ;;  %1521 = vst.msk [vmem:[%s2355_s27 + $0xc0] sm:$0xff] %vm1496_vm1, %v1456_v56 }
 0x164   : > { %v964_v35 = vpop.f32.mrf.mxu3 }
 0x165   : > { %v1040_v57 = vmax.f32 %v763_v55, %v964_v35  ;;  %v685_v21 = vpop.f32.mrf.mxu0 }
 0x166   : > { %v886_v61 = vpop.f32.mrf.mxu1 }
 0x167   : > { %v1488_v4 = vadd.f32 %v1395_v60, %v1040_v57  ;;  %v1009_v38 = vmax.f32 %v685_v21, %v886_v61  ;;  %v1430_v21 = vpop.permute.xlu0 %1429 }
 0x169   : > { %1553 = vst.msk [vmem:[%s2355_s27 + $0x1c0] sm:$0xff] %vm1496_vm1, %v1488_v4  ;;  %v1457_v5 = vadd.f32 %v2430_v36, %v1009_v38 }
 0x16b   : > { %v765_v1 = vpop.f32.mrf.mxu2  ;;  %1522 = vst.msk [vmem:[%s2355_s27 + $0xc8] sm:$0xff] %vm1496_vm1, %v1457_v5 }
 0x16c   : > { %v966_v14 = vpop.f32.mrf.mxu3 }
 0x16d   : > { %v1041_v6 = vmax.f32 %v765_v1, %v966_v14  ;;  %v688_v9 = vpop.f32.mrf.mxu0 }
 0x16e   : > { %v889_v15 = vpop.f32.mrf.mxu1 }
 0x16f   : > { %v1489_v11 = vadd.f32 %v1400_v3, %v1041_v6  ;;  %v1010_v16 = vmax.f32 %v688_v9, %v889_v15 }
 0x171   : > { %1554 = vst.msk [vmem:[%s2355_s27 + $0x1c8] sm:$0xff] %vm1496_vm1, %v1489_v11  ;;  %v1458_v37 = vadd.f32 %v2367_v47, %v1010_v16 }
 0x173   : > { %v768_v17 = vpop.f32.mrf.mxu2  ;;  %1523 = vst.msk [vmem:[%s2355_s27 + $0xd0] sm:$0xff] %vm1496_vm1, %v1458_v37 }
 0x174   : > { %v969_v36 = vpop.f32.mrf.mxu3 }
 0x175   : > { %v1042_v20 = vmax.f32 %v768_v17, %v969_v36  ;;  %v690_v8 = vpop.f32.mrf.mxu0 }
 0x176   : > { %v891_v23 = vpop.f32.mrf.mxu1 }
 0x177   : > { %v1490_v2 = vadd.f32 %v1405_v24, %v1042_v20  ;;  %v1011_v29 = vmax.f32 %v690_v8, %v891_v23 }
 0x179   : > { %1555 = vst.msk [vmem:[%s2355_s27 + $0x1d0] sm:$0xff] %vm1496_vm1, %v1490_v2  ;;  %v1459_v25 = vadd.f32 %v2445_v48, %v1011_v29 }
 0x17b   : > { %v770_v26 = vpop.f32.mrf.mxu2  ;;  %1524 = vst.msk [vmem:[%s2355_s27 + $0xd8] sm:$0xff] %vm1496_vm1, %v1459_v25 }
 0x17c   : > { %v971_v47 = vpop.f32.mrf.mxu3 }
 0x17d   : > { %v1043_v30 = vmax.f32 %v770_v26, %v971_v47  ;;  %v693_v31 = vpop.f32.mrf.mxu0 }
 0x17e   : > { %v894_v27 = vpop.f32.mrf.mxu1 }
 0x17f   : > { %v1491_v58 = vadd.f32 %v1410_v13, %v1043_v30  ;;  %v1012_v59 = vmax.f32 %v693_v31, %v894_v27 }
 0x181   : > { %1556 = vst.msk [vmem:[%s2355_s27 + $0x1d8] sm:$0xff] %vm1496_vm1, %v1491_v58  ;;  %v1460_v10 = vadd.f32 %v2443_v46, %v1012_v59 }
 0x183   : > { %v773_v12 = vpop.f32.mrf.mxu2  ;;  %1525 = vst.msk [vmem:[%s2355_s27 + $0xe0] sm:$0xff] %vm1496_vm1, %v1460_v10 }
 0x184   : > { %v974_v48 = vpop.f32.mrf.mxu3 }
 0x185   : > { %v1044_v32 = vmax.f32 %v773_v12, %v974_v48  ;;  %v695_v33 = vpop.f32.mrf.mxu0 }
 0x186   : > { %v896_v50 = vpop.f32.mrf.mxu1 }
 0x187   : > { %v1492_v28 = vadd.f32 %v1415_v34, %v1044_v32  ;;  %v1013_v19 = vmax.f32 %v695_v33, %v896_v50 }
 0x189   : > { %1557 = vst.msk [vmem:[%s2355_s27 + $0x1e0] sm:$0xff] %vm1496_vm1, %v1492_v28  ;;  %v1461_v22 = vadd.f32 %v2395_v63, %v1013_v19 }
 0x18b   : > { %v775_v39 = vpop.f32.mrf.mxu2  ;;  %1526 = vst.msk [vmem:[%s2355_s27 + $0xe8] sm:$0xff] %vm1496_vm1, %v1461_v22 }
 0x18c   : > { %v976_v46 = vpop.f32.mrf.mxu3 }
 0x18d   : > { %v1045_v40 = vmax.f32 %v775_v39, %v976_v46  ;;  %v698_v41 = vpop.f32.mrf.mxu0 }
 0x18e   : > { %v899_v51 = vpop.f32.mrf.mxu1 }
 0x18f   : > { %v1493_v45 = vadd.f32 %v1420_v42, %v1045_v40  ;;  %v1014_v7 = vmax.f32 %v698_v41, %v899_v51 }
 0x191   : > { %1558 = vst.msk [vmem:[%s2355_s27 + $0x1e8] sm:$0xff] %vm1496_vm1, %v1493_v45  ;;  %v1462_v18 = vadd.f32 %v2458_v0, %v1014_v7 }
 0x193   : > { %v778_v49 = vpop.f32.mrf.mxu2  ;;  %1527 = vst.msk [vmem:[%s2355_s27 + $0xf0] sm:$0xff] %vm1496_vm1, %v1462_v18 }
 0x194   : > { %v979_v63 = vpop.f32.mrf.mxu3 }
 0x195   : > { %v1046_v43 = vmax.f32 %v778_v49, %v979_v63  ;;  %v700_v44 = vpop.f32.mrf.mxu0 }
 0x196   : > { %v901_v54 = vpop.f32.mrf.mxu1 }
 0x197   : > { %v1494_v53 = vadd.f32 %v1425_v52, %v1046_v43  ;;  %v1015_v56 = vmax.f32 %v700_v44, %v901_v54 }
 0x199   : > { %1559 = vst.msk [vmem:[%s2355_s27 + $0x1f0] sm:$0xff] %vm1496_vm1, %v1494_v53  ;;  %v1463_v55 = vadd.f32 %v2456_v62, %v1015_v56 }
 0x19b   : > { %v780_v35 = vpop.f32.mrf.mxu2  ;;  %1528 = vst.msk [vmem:[%s2355_s27 + $0xf8] sm:$0xff] %vm1496_vm1, %v1463_v55 }
 0x19c   : > { %v981_v57 = vpop.f32.mrf.mxu3 }
 0x19d   : > { %v1047_v0 = vmax.f32 %v780_v35, %v981_v57 }
 0x19f   : > { %v1495_v60 = vadd.f32 %v1430_v21, %v1047_v0 }
 0x1a1   : > { %1560 = vst.msk [vmem:[%s2355_s27 + $0x1f8] sm:$0xff] %vm1496_vm1, %v1495_v60 }
 0x1a2 PF: > { %s14_s17 = sadd.s32 1, %s2000_s17   ;;  %s2660_s15 = smov %s1996_s16 }
 0x1a3   : > { %p11_p5 = scmp.ge.s32.totalorder %s14_s17, 4   ;;  %s2661_s16 = smov %s2663_s18 }
 0x1a5   :  { %13 = sbr.rel (!%p11_p5) target bundleno = 2 (0x2), region = 69 }

</bundles_post_ra>
